<compile_context>
chip_gen: v5e
topology: v5e:2x2
jax: 0.10.0
libtpu: 0.0.40
codegen_flags: <defaults>
</compile_context>

<pallas_src>
import functools

import jax
import jax.numpy as jnp
from jax.experimental import pallas as pl
from jax.experimental.pallas import tpu as pltpu

KNOWN_DIM = 2
LANE = 128


def _round_up(n, m):
    return (n + m - 1) // m * m


# ---------------------------------------------------------------------------
# Kernel
# ---------------------------------------------------------------------------
def ccm_kernel(x_ref,
               w1, b1, w2, b2, w3, b3,          # fused (block-diagonal) c/u MLP
               wy1, by1, wy2, by2, wy3, by3,    # y MLP
               c_ref, y_ref):
    """One batch tile. bf16 matmul operands, f32 accumulation / bias / ReLU."""

    def dot(a_f32, w_bf16_ref):
        return jnp.dot(a_f32.astype(jnp.bfloat16), w_bf16_ref[...],
                       preferred_element_type=jnp.float32)

    x = x_ref[...]                                      # (TB, D) f32

    # Fused c/u MLP: result lanes [0:H_pad] = c, lanes [H_pad:2*H_pad] = u.
    h = jnp.maximum(dot(x, w1) + b1[...], 0.0)          # (TB, 2*H_pad)
    h = jnp.maximum(dot(h, w2) + b2[...], 0.0)
    cu = dot(h, w3) + b3[...]                           # (TB, 2*H_pad)

    c_ref[...] = cu[:, :c_ref.shape[1]]                 # lane-aligned (0:H_pad)

    # y MLP on cu.
    h = jnp.maximum(dot(cu, wy1) + by1[...], 0.0)       # (TB, H_pad)
    h = jnp.maximum(dot(h, wy2) + by2[...], 0.0)
    y_ref[...] = dot(h, wy3) + by3[...]                 # (TB, O_pad)


# ---------------------------------------------------------------------------
# Wrapper: param packing + pallas_call
# ---------------------------------------------------------------------------
def _pack_params(params, D, H, out_dim, H_pad, O_pad, compute_dtype):
    """Build block-diagonal / lane-padded weights from per-branch params.

    params: dict with keys 'c', 'u', 'y'; each is [w1, b1, w2, b2, w3, b3]
    with w: [in, out] and b: [1, out] (f32).
    """
    wc1, bc1, wc2, bc2, wc3, bc3 = params["c"]
    wu1, bu1, wu2, bu2, wu3, bu3 = params["u"]
    wy1, by1, wy2, by2, wy3, by3 = params["y"]
    known = KNOWN_DIM

    # Layer 1: known rows -> c half, unknown rows -> u half.
    w1 = jnp.zeros((D, 2 * H_pad), jnp.float32)
    w1 = w1.at[:known, :H].set(wc1)
    w1 = w1.at[known:, H_pad:H_pad + H].set(wu1)

    def cat_bias(bc, bu):
        b = jnp.zeros((1, 2 * H_pad), jnp.float32)
        return b.at[:, :H].set(bc).at[:, H_pad:H_pad + H].set(bu)

    def blockdiag(wc, wu):
        w = jnp.zeros((2 * H_pad, 2 * H_pad), jnp.float32)
        w = w.at[:H, :H].set(wc)
        w = w.at[H_pad:H_pad + H, H_pad:H_pad + H].set(wu)
        return w

    b1 = cat_bias(bc1, bu1)
    w2, b2 = blockdiag(wc2, wu2), cat_bias(bc2, bu2)
    w3, b3 = blockdiag(wc3, wu3), cat_bias(bc3, bu3)

    # y MLP: remap cu rows (c rows keep offset 0, u rows move to H_pad offset).
    wy1p = jnp.zeros((2 * H_pad, H_pad), jnp.float32)
    wy1p = wy1p.at[:H, :H].set(wy1[:H])
    wy1p = wy1p.at[H_pad:H_pad + H, :H].set(wy1[H:])
    by1p = jnp.zeros((1, H_pad), jnp.float32).at[:, :H].set(by1)

    wy2p = jnp.zeros((H_pad, H_pad), jnp.float32).at[:H, :H].set(wy2)
    by2p = jnp.zeros((1, H_pad), jnp.float32).at[:, :H].set(by2)

    wy3p = jnp.zeros((H_pad, O_pad), jnp.float32).at[:H, :out_dim].set(wy3)
    by3p = jnp.zeros((1, O_pad), jnp.float32).at[:, :out_dim].set(by3)

    weights = [w1, w2, w3, wy1p, wy2p, wy3p]
    biases = [b1, b2, b3, by1p, by2p, by3p]
    weights = [w.astype(compute_dtype) for w in weights]  # bf16 MXU operands

    flat = []
    for w, b in zip(weights, biases):
        flat += [w, b]
    return flat


@functools.partial(jax.jit, static_argnames=("batch_tile",))
def ccm_forward(x, params, batch_tile=512):
    B, D = x.shape
    H = params["c"][4].shape[1]        # net_c output dim == hidden
    out_dim = params["y"][4].shape[1]
    H_pad = _round_up(H, LANE)
    O_pad = _round_up(out_dim, LANE)

    # Batch tile sized for pipelining; shrink it if it would force excessive
    # batch padding (keeps waste < half a tile while staying >= 128 rows).
    TB = min(batch_tile, _round_up(B, 8))
    while TB > 128 and _round_up(B, TB) - B >= TB // 2:
        TB //= 2
    B_pad = _round_up(B, TB)

    flat = _pack_params(params, D, H, out_dim, H_pad, O_pad, jnp.bfloat16)

    x_p = x if B_pad == B else jnp.zeros((B_pad, D), x.dtype).at[:B].set(x)

    grid = (B_pad // TB,)

    def resident(shape):  # weight/bias: full block, same index every grid step
        return pl.BlockSpec(shape, lambda i: (0, 0))

    in_specs = ([pl.BlockSpec((TB, D), lambda i: (i, 0))]
                + [resident(a.shape) for a in flat])
    out_specs = (pl.BlockSpec((TB, H_pad), lambda i: (i, 0)),
                 pl.BlockSpec((TB, O_pad), lambda i: (i, 0)))
    out_shape = (jax.ShapeDtypeStruct((B_pad, H_pad), jnp.float32),
                 jax.ShapeDtypeStruct((B_pad, O_pad), jnp.float32))

    flops = 2 * B_pad * (D * 2 * H_pad + 2 * (2 * H_pad) ** 2
                         + 2 * H_pad * H_pad + H_pad * H_pad + H_pad * O_pad)
    bytes_accessed = (x_p.size * x_p.dtype.itemsize
                      + sum(a.size * a.dtype.itemsize for a in flat)
                      + B_pad * (H_pad + O_pad) * 4)

    c_pad, y_pad = pl.pallas_call(
        ccm_kernel,
        out_shape=out_shape,
        grid=grid,
        in_specs=in_specs,
        out_specs=out_specs,
        compiler_params=pltpu.CompilerParams(
            dimension_semantics=("parallel",)),
        cost_estimate=pl.CostEstimate(
            flops=flops, transcendentals=0, bytes_accessed=bytes_accessed),
    )(x_p, *flat)

    return c_pad[:B, :H], y_pad[:B, :out_dim]


# ---------------------------------------------------------------------------
# Init + pure-JAX reference (same bf16-operand / f32-accumulate numerics)
# ---------------------------------------------------------------------------
def _init_linear(key, in_dim, out_dim):
    kw, kb = jax.random.split(key)
    bound = 1.0 / jnp.sqrt(jnp.float32(in_dim))
    w = jax.random.uniform(kw, (in_dim, out_dim), jnp.float32, -bound, bound)
    b = jax.random.uniform(kb, (1, out_dim), jnp.float32, -bound, bound)
    return w, b


def _init_mlp(key, in_dim, hidden_dim, out_dim):
    k1, k2, k3 = jax.random.split(key, 3)
    w1, b1 = _init_linear(k1, in_dim, hidden_dim)
    w2, b2 = _init_linear(k2, hidden_dim, hidden_dim)
    w3, b3 = _init_linear(k3, hidden_dim, out_dim)
    return [w1, b1, w2, b2, w3, b3]


def init_ccm_params(key, known_dim, unknown_dim, hidden_dim, output_dim):
    kc, ku, ky = jax.random.split(key, 3)
    return {
        "c": _init_mlp(kc, known_dim, hidden_dim, hidden_dim),
        "u": _init_mlp(ku, unknown_dim, hidden_dim, hidden_dim),
        "y": _init_mlp(ky, hidden_dim * 2, hidden_dim, output_dim),
    }


def ccm_reference(x, params):
    """Pure-JAX reference using the same bf16-operand / f32-accum path."""
    def dot(a, w):
        return jnp.dot(a.astype(jnp.bfloat16), w.astype(jnp.bfloat16),
                       preferred_element_type=jnp.float32)

    def mlp(h, w1, b1, w2, b2, w3, b3):
        h = jnp.maximum(dot(h, w1) + b1, 0.0)
        h = jnp.maximum(dot(h, w2) + b2, 0.0)
        return dot(h, w3) + b3

    known = x[:, :KNOWN_DIM]
    unknown = x[:, KNOWN_DIM:]
    c = mlp(known, *params["c"])
    u = mlp(unknown, *params["u"])
    cu = jnp.concatenate([c, u], axis=1)
    y = mlp(cu, *params["y"])
    return c, y


# TODO(synk): EYERegularization / apply_eye_regularization is a training-time
# penalty on parameters, not part of the forward pass, so it is not ported.

if __name__ == "__main__":
    key = jax.random.PRNGKey(0)
    kx, kp = jax.random.split(key)

    # Small deterministic example: batch=8, features=8
    # -> known=2, unknown=6, hidden=32, output=4.
    B, D = 8, 8
    hidden_dim, output_dim = 32, 4
    known_dim, unknown_dim = KNOWN_DIM, D - KNOWN_DIM

    x = jax.random.normal(kx, (B, D), jnp.float32)
    params = init_ccm_params(kp, known_dim, unknown_dim, hidden_dim, output_dim)

    c_out, y_out = ccm_forward(x, params)
    jax.block_until_ready((c_out, y_out))

    c_ref, y_ref = ccm_reference(x, params)
    assert c_out.shape == (B, hidden_dim)
    assert y_out.shape == (B, output_dim)
    assert jnp.allclose(c_out, c_ref, atol=2e-3, rtol=2e-3), \
        float(jnp.max(jnp.abs(c_out - c_ref)))
    assert jnp.allclose(y_out, y_ref, atol=2e-3, rtol=2e-3), \
        float(jnp.max(jnp.abs(y_out - y_ref)))

    print("KERNEL_OK")
</pallas_src>

<mosaic_0001>
module attributes {stable_mosaic.version = 11 : i64} {
  func.func @ccm_kernel(%arg0: i32, %arg1: memref<8x8xf32, #tpu.memory_space<vmem>>, %arg2: memref<8x256xbf16, #tpu.memory_space<vmem>>, %arg3: memref<1x256xf32, #tpu.memory_space<vmem>>, %arg4: memref<256x256xbf16, #tpu.memory_space<vmem>>, %arg5: memref<1x256xf32, #tpu.memory_space<vmem>>, %arg6: memref<256x256xbf16, #tpu.memory_space<vmem>>, %arg7: memref<1x256xf32, #tpu.memory_space<vmem>>, %arg8: memref<256x128xbf16, #tpu.memory_space<vmem>>, %arg9: memref<1x128xf32, #tpu.memory_space<vmem>>, %arg10: memref<128x128xbf16, #tpu.memory_space<vmem>>, %arg11: memref<1x128xf32, #tpu.memory_space<vmem>>, %arg12: memref<128x128xbf16, #tpu.memory_space<vmem>>, %arg13: memref<1x128xf32, #tpu.memory_space<vmem>>, %arg14: memref<8x128xf32, #tpu.memory_space<vmem>>, %arg15: memref<8x128xf32, #tpu.memory_space<vmem>>) attributes {dimension_semantics = [#tpu.dimension_semantics<parallel>], iteration_bounds = array<i64: 1>, scalar_prefetch = 0 : i64, scratch_operands = 0 : i64, tpu.core_type = #tpu.core_type<tc>, window_params = [{transform_indices = @transform_0, window_bounds = array<i64: 8, 8>}, {pipeline_mode = #tpu.pipeline_mode<synchronous>, transform_indices = @transform_1, window_bounds = array<i64: 8, 256>}, {pipeline_mode = #tpu.pipeline_mode<synchronous>, transform_indices = @transform_2, window_bounds = array<i64: 1, 256>}, {pipeline_mode = #tpu.pipeline_mode<synchronous>, transform_indices = @transform_3, window_bounds = array<i64: 256, 256>}, {pipeline_mode = #tpu.pipeline_mode<synchronous>, transform_indices = @transform_4, window_bounds = array<i64: 1, 256>}, {pipeline_mode = #tpu.pipeline_mode<synchronous>, transform_indices = @transform_5, window_bounds = array<i64: 256, 256>}, {pipeline_mode = #tpu.pipeline_mode<synchronous>, transform_indices = @transform_6, window_bounds = array<i64: 1, 256>}, {pipeline_mode = #tpu.pipeline_mode<synchronous>, transform_indices = @transform_7, window_bounds = array<i64: 256, 128>}, {pipeline_mode = #tpu.pipeline_mode<synchronous>, transform_indices = @transform_8, window_bounds = array<i64: 1, 128>}, {pipeline_mode = #tpu.pipeline_mode<synchronous>, transform_indices = @transform_9, window_bounds = array<i64: 128, 128>}, {pipeline_mode = #tpu.pipeline_mode<synchronous>, transform_indices = @transform_10, window_bounds = array<i64: 1, 128>}, {pipeline_mode = #tpu.pipeline_mode<synchronous>, transform_indices = @transform_11, window_bounds = array<i64: 128, 128>}, {pipeline_mode = #tpu.pipeline_mode<synchronous>, transform_indices = @transform_12, window_bounds = array<i64: 1, 128>}, {transform_indices = @transform_13, window_bounds = array<i64: 8, 128>}, {transform_indices = @transform_14, window_bounds = array<i64: 8, 128>}]} {
    %c0 = arith.constant 0 : index
    %c0_0 = arith.constant 0 : index
    %0 = vector.load %arg1[%c0, %c0_0] : memref<8x8xf32, #tpu.memory_space<vmem>>, vector<8x8xf32>
    %1 = arith.truncf %0 : vector<8x8xf32> to vector<8x8xbf16>
    %c0_1 = arith.constant 0 : index
    %c0_2 = arith.constant 0 : index
    %2 = vector.load %arg2[%c0_1, %c0_2] : memref<8x256xbf16, #tpu.memory_space<vmem>>, vector<8x256xbf16>
    %cst = arith.constant dense<0.000000e+00> : vector<8x256xf32>
    %3 = tpu.matmul %1, %2, %cst {dimension_numbers = #tpu.dot_dimension_numbers<[1], [0], [0], [1], [0, 0, 1, 1], [], []>} : vector<8x8xbf16>, vector<8x256xbf16>, vector<8x256xf32> -> vector<8x256xf32>
    %c0_3 = arith.constant 0 : index
    %c0_4 = arith.constant 0 : index
    %4 = vector.load %arg3[%c0_3, %c0_4] : memref<1x256xf32, #tpu.memory_space<vmem>>, vector<1x256xf32>
    %5 = vector.broadcast %4 : vector<1x256xf32> to vector<8x256xf32>
    %6 = arith.addf %3, %5 : vector<8x256xf32>
    %cst_5 = arith.constant 0.000000e+00 : f32
    %7 = vector.broadcast %cst_5 : f32 to vector<8x256xf32>
    %8 = arith.maximumf %6, %7 : vector<8x256xf32>
    %9 = arith.truncf %8 : vector<8x256xf32> to vector<8x256xbf16>
    %c0_6 = arith.constant 0 : index
    %c0_7 = arith.constant 0 : index
    %10 = vector.load %arg4[%c0_6, %c0_7] : memref<256x256xbf16, #tpu.memory_space<vmem>>, vector<256x256xbf16>
    %cst_8 = arith.constant dense<0.000000e+00> : vector<8x256xf32>
    %11 = tpu.matmul %9, %10, %cst_8 {dimension_numbers = #tpu.dot_dimension_numbers<[1], [0], [0], [1], [0, 0, 1, 1], [], []>} : vector<8x256xbf16>, vector<256x256xbf16>, vector<8x256xf32> -> vector<8x256xf32>
    %c0_9 = arith.constant 0 : index
    %c0_10 = arith.constant 0 : index
    %12 = vector.load %arg5[%c0_9, %c0_10] : memref<1x256xf32, #tpu.memory_space<vmem>>, vector<1x256xf32>
    %13 = vector.broadcast %12 : vector<1x256xf32> to vector<8x256xf32>
    %14 = arith.addf %11, %13 : vector<8x256xf32>
    %cst_11 = arith.constant 0.000000e+00 : f32
    %15 = vector.broadcast %cst_11 : f32 to vector<8x256xf32>
    %16 = arith.maximumf %14, %15 : vector<8x256xf32>
    %17 = arith.truncf %16 : vector<8x256xf32> to vector<8x256xbf16>
    %c0_12 = arith.constant 0 : index
    %c0_13 = arith.constant 0 : index
    %18 = vector.load %arg6[%c0_12, %c0_13] : memref<256x256xbf16, #tpu.memory_space<vmem>>, vector<256x256xbf16>
    %cst_14 = arith.constant dense<0.000000e+00> : vector<8x256xf32>
    %19 = tpu.matmul %17, %18, %cst_14 {dimension_numbers = #tpu.dot_dimension_numbers<[1], [0], [0], [1], [0, 0, 1, 1], [], []>} : vector<8x256xbf16>, vector<256x256xbf16>, vector<8x256xf32> -> vector<8x256xf32>
    %c0_15 = arith.constant 0 : index
    %c0_16 = arith.constant 0 : index
    %20 = vector.load %arg7[%c0_15, %c0_16] : memref<1x256xf32, #tpu.memory_space<vmem>>, vector<1x256xf32>
    %21 = vector.broadcast %20 : vector<1x256xf32> to vector<8x256xf32>
    %22 = arith.addf %19, %21 : vector<8x256xf32>
    %23 = vector.extract_strided_slice %22 {offsets = [0, 0], sizes = [8, 128], strides = [1, 1]} : vector<8x256xf32> to vector<8x128xf32>
    %c0_17 = arith.constant 0 : index
    %c0_18 = arith.constant 0 : index
    %24 = vector.load %arg14[%c0_17, %c0_18] : memref<8x128xf32, #tpu.memory_space<vmem>>, vector<8x128xf32>
    tpu.vector_store %arg14[%c0_17, %c0_18], %23 {strides = array<i32>} : memref<8x128xf32, #tpu.memory_space<vmem>>, vector<8x128xf32>,
    %25 = arith.truncf %22 : vector<8x256xf32> to vector<8x256xbf16>
    %c0_19 = arith.constant 0 : index
    %c0_20 = arith.constant 0 : index
    %26 = vector.load %arg8[%c0_19, %c0_20] : memref<256x128xbf16, #tpu.memory_space<vmem>>, vector<256x128xbf16>
    %cst_21 = arith.constant dense<0.000000e+00> : vector<8x128xf32>
    %27 = tpu.matmul %25, %26, %cst_21 {dimension_numbers = #tpu.dot_dimension_numbers<[1], [0], [0], [1], [0, 0, 1, 1], [], []>} : vector<8x256xbf16>, vector<256x128xbf16>, vector<8x128xf32> -> vector<8x128xf32>
    %c0_22 = arith.constant 0 : index
    %c0_23 = arith.constant 0 : index
    %28 = vector.load %arg9[%c0_22, %c0_23] : memref<1x128xf32, #tpu.memory_space<vmem>>, vector<1x128xf32>
    %29 = vector.broadcast %28 : vector<1x128xf32> to vector<8x128xf32>
    %30 = arith.addf %27, %29 : vector<8x128xf32>
    %cst_24 = arith.constant 0.000000e+00 : f32
    %31 = vector.broadcast %cst_24 : f32 to vector<8x128xf32>
    %32 = arith.maximumf %30, %31 : vector<8x128xf32>
    %33 = arith.truncf %32 : vector<8x128xf32> to vector<8x128xbf16>
    %c0_25 = arith.constant 0 : index
    %c0_26 = arith.constant 0 : index
    %34 = vector.load %arg10[%c0_25, %c0_26] : memref<128x128xbf16, #tpu.memory_space<vmem>>, vector<128x128xbf16>
    %cst_27 = arith.constant dense<0.000000e+00> : vector<8x128xf32>
    %35 = tpu.matmul %33, %34, %cst_27 {dimension_numbers = #tpu.dot_dimension_numbers<[1], [0], [0], [1], [0, 0, 1, 1], [], []>} : vector<8x128xbf16>, vector<128x128xbf16>, vector<8x128xf32> -> vector<8x128xf32>
    %c0_28 = arith.constant 0 : index
    %c0_29 = arith.constant 0 : index
    %36 = vector.load %arg11[%c0_28, %c0_29] : memref<1x128xf32, #tpu.memory_space<vmem>>, vector<1x128xf32>
    %37 = vector.broadcast %36 : vector<1x128xf32> to vector<8x128xf32>
    %38 = arith.addf %35, %37 : vector<8x128xf32>
    %cst_30 = arith.constant 0.000000e+00 : f32
    %39 = vector.broadcast %cst_30 : f32 to vector<8x128xf32>
    %40 = arith.maximumf %38, %39 : vector<8x128xf32>
    %41 = arith.truncf %40 : vector<8x128xf32> to vector<8x128xbf16>
    %c0_31 = arith.constant 0 : index
    %c0_32 = arith.constant 0 : index
    %42 = vector.load %arg12[%c0_31, %c0_32] : memref<128x128xbf16, #tpu.memory_space<vmem>>, vector<128x128xbf16>
    %cst_33 = arith.constant dense<0.000000e+00> : vector<8x128xf32>
    %43 = tpu.matmul %41, %42, %cst_33 {dimension_numbers = #tpu.dot_dimension_numbers<[1], [0], [0], [1], [0, 0, 1, 1], [], []>} : vector<8x128xbf16>, vector<128x128xbf16>, vector<8x128xf32> -> vector<8x128xf32>
    %c0_34 = arith.constant 0 : index
    %c0_35 = arith.constant 0 : index
    %44 = vector.load %arg13[%c0_34, %c0_35] : memref<1x128xf32, #tpu.memory_space<vmem>>, vector<1x128xf32>
    %45 = vector.broadcast %44 : vector<1x128xf32> to vector<8x128xf32>
    %46 = arith.addf %43, %45 : vector<8x128xf32>
    %c0_36 = arith.constant 0 : index
    %c0_37 = arith.constant 0 : index
    %47 = vector.load %arg15[%c0_36, %c0_37] : memref<8x128xf32, #tpu.memory_space<vmem>>, vector<8x128xf32>
    tpu.vector_store %arg15[%c0_36, %c0_37], %46 {strides = array<i32>} : memref<8x128xf32, #tpu.memory_space<vmem>>, vector<8x128xf32>,
    return
  }
  func.func @transform_0(%arg0: i32) -> (i32, i32) {
    %c0_i32 = arith.constant 0 : i32
    %c0_i32_0 = arith.constant 0 : i32
    return %arg0, %c0_i32 : i32, i32
  }
  func.func @transform_1(%arg0: i32) -> (i32, i32) {
    %c0_i32 = arith.constant 0 : i32
    %c0_i32_0 = arith.constant 0 : i32
    %c0_i32_1 = arith.constant 0 : i32
    return %c0_i32, %c0_i32_0 : i32, i32
  }
  func.func @transform_2(%arg0: i32) -> (i32, i32) {
    %c0_i32 = arith.constant 0 : i32
    %c0_i32_0 = arith.constant 0 : i32
    %c0_i32_1 = arith.constant 0 : i32
    return %c0_i32, %c0_i32_0 : i32, i32
  }
  func.func @transform_3(%arg0: i32) -> (i32, i32) {
    %c0_i32 = arith.constant 0 : i32
    %c0_i32_0 = arith.constant 0 : i32
    %c0_i32_1 = arith.constant 0 : i32
    return %c0_i32, %c0_i32_0 : i32, i32
  }
  func.func @transform_4(%arg0: i32) -> (i32, i32) {
    %c0_i32 = arith.constant 0 : i32
    %c0_i32_0 = arith.constant 0 : i32
    %c0_i32_1 = arith.constant 0 : i32
    return %c0_i32, %c0_i32_0 : i32, i32
  }
  func.func @transform_5(%arg0: i32) -> (i32, i32) {
    %c0_i32 = arith.constant 0 : i32
    %c0_i32_0 = arith.constant 0 : i32
    %c0_i32_1 = arith.constant 0 : i32
    return %c0_i32, %c0_i32_0 : i32, i32
  }
  func.func @transform_6(%arg0: i32) -> (i32, i32) {
    %c0_i32 = arith.constant 0 : i32
    %c0_i32_0 = arith.constant 0 : i32
    %c0_i32_1 = arith.constant 0 : i32
    return %c0_i32, %c0_i32_0 : i32, i32
  }
  func.func @transform_7(%arg0: i32) -> (i32, i32) {
    %c0_i32 = arith.constant 0 : i32
    %c0_i32_0 = arith.constant 0 : i32
    %c0_i32_1 = arith.constant 0 : i32
    return %c0_i32, %c0_i32_0 : i32, i32
  }
  func.func @transform_8(%arg0: i32) -> (i32, i32) {
    %c0_i32 = arith.constant 0 : i32
    %c0_i32_0 = arith.constant 0 : i32
    %c0_i32_1 = arith.constant 0 : i32
    return %c0_i32, %c0_i32_0 : i32, i32
  }
  func.func @transform_9(%arg0: i32) -> (i32, i32) {
    %c0_i32 = arith.constant 0 : i32
    %c0_i32_0 = arith.constant 0 : i32
    %c0_i32_1 = arith.constant 0 : i32
    return %c0_i32, %c0_i32_0 : i32, i32
  }
  func.func @transform_10(%arg0: i32) -> (i32, i32) {
    %c0_i32 = arith.constant 0 : i32
    %c0_i32_0 = arith.constant 0 : i32
    %c0_i32_1 = arith.constant 0 : i32
    return %c0_i32, %c0_i32_0 : i32, i32
  }
  func.func @transform_11(%arg0: i32) -> (i32, i32) {
    %c0_i32 = arith.constant 0 : i32
    %c0_i32_0 = arith.constant 0 : i32
    %c0_i32_1 = arith.constant 0 : i32
    return %c0_i32, %c0_i32_0 : i32, i32
  }
  func.func @transform_12(%arg0: i32) -> (i32, i32) {
    %c0_i32 = arith.constant 0 : i32
    %c0_i32_0 = arith.constant 0 : i32
    %c0_i32_1 = arith.constant 0 : i32
    return %c0_i32, %c0_i32_0 : i32, i32
  }
  func.func @transform_13(%arg0: i32) -> (i32, i32) {
    %c0_i32 = arith.constant 0 : i32
    %c0_i32_0 = arith.constant 0 : i32
    return %arg0, %c0_i32 : i32, i32
  }
  func.func @transform_14(%arg0: i32) -> (i32, i32) {
    %c0_i32 = arith.constant 0 : i32
    %c0_i32_0 = arith.constant 0 : i32
    return %arg0, %c0_i32 : i32, i32
  }
}

</mosaic_0001>

<bundles_post_ra>
// kernel: ccm_forward.1
= control target key start
LH: loop header
LB: loop body
LE: loop exit
PB: predicated region body
PF: predicated region fallthrough
CT: control target
= control target key end

     0   :  { %vm66_vm0 = vcmask 1043456   ;;  %vm62_vm1 = vcmask 64512   ;;  %s2057_s0 = inlined_call_operand.vmem [shape: f32[8,8], index: 0, kind: input, shape index: {}]   ;;  %s2058_s1 = inlined_call_operand.vmem [shape: bf16[8,256], index: 1, kind: input, shape index: {}]   ;;  %s2059_s2 = inlined_call_operand.vmem [shape: f32[1,256], index: 2, kind: input, shape index: {}]   ;;  %s2060_s3 = inlined_call_operand.vmem [shape: bf16[256,256], index: 3, kind: input, shape index: {}]   ;;  %s2061_s4 = inlined_call_operand.vmem [shape: f32[1,256], index: 4, kind: input, shape index: {}]   ;;  %s2062_s5 = inlined_call_operand.vmem [shape: bf16[256,256], index: 5, kind: input, shape index: {}]   ;;  %s2063_s6 = inlined_call_operand.vmem [shape: f32[1,256], index: 6, kind: input, shape index: {}]   ;;  %s2064_s7 = inlined_call_operand.vmem [shape: bf16[256,128], index: 7, kind: input, shape index: {}]   ;;  %s2065_s8 = inlined_call_operand.vmem [shape: f32[1,128], index: 8, kind: input, shape index: {}]   ;;  %s2066_s9 = inlined_call_operand.vmem [shape: bf16[128,128], index: 9, kind: input, shape index: {}]   ;;  %s2067_s10 = inlined_call_operand.vmem [shape: f32[1,128], index: 10, kind: input, shape index: {}]   ;;  %s2068_s11 = inlined_call_operand.vmem [shape: bf16[128,128], index: 11, kind: input, shape index: {}]   ;;  %s2069_s12 = inlined_call_operand.vmem [shape: f32[1,128], index: 12, kind: input, shape index: {}]   ;;  %s2070_s13 = inlined_call_operand.hbm [shape: f32[8,128], index: 13, kind: output, shape index: {0}]   ;;  %s2071_s14 = inlined_call_operand.vmem [shape: f32[8,128], index: 14, kind: output, shape index: {1}]  }
   0x1   :  { %v50_v0 = vld [vmem:[%s2058_s1] sm:$0xff]  ;;  %v1015_v2 = vld [vmem:[%s2060_s3 + $0x70] sm:$0xf]  ;;  %v1356_v5 = vld [vmem:[%s2060_s3 + $0x74] sm:$0xf0] }
   0x2   :  { %v48_v1 = vld [vmem:[%s2057_s0] sm:$0xff]  ;;  %v58_v3 = vunpack.c.l.b16 %v50_v0  ;;  %v59_v4 = vunpack.c.h.b16 %v50_v0  ;;  %v1079_v6 = vld [vmem:[%s2060_s3 + $0xf0] sm:$0xf]  ;;  %v1372_v7 = vld [vmem:[%s2060_s3 + $0xf4] sm:$0xf0]  ;;  %v1016_v8 = vor.u32 %v1356_v5, %v1015_v2 }
   0x3   :  { %v1080_v9 = vor.u32 %v1372_v7, %v1079_v6  ;;  %v1355_v10 = vld [vmem:[%s2060_s3 + $0x74] sm:$0xf]  ;;  %v1017_v11 = vld [vmem:[%s2060_s3 + $0x78] sm:$0xf0]  ;;  %v1007_v17 = vld [vmem:[%s2060_s3 + $0x60] sm:$0xf]  ;;  %v49_v26 = vpack.c.bf16 %v48_v1, %v48_v1 }
   0x4   :  { %v1371_v12 = vld [vmem:[%s2060_s3 + $0xf4] sm:$0xf]  ;;  %v60_v13 = vpack.c.b16 %v58_v3, %v58_v3  ;;  %v61_v14 = vpack.c.b16 %v59_v4, %v59_v4  ;;  %v1020_v15 = vor.u32 %v1355_v10, %v1017_v11  ;;  %v1081_v16 = vld [vmem:[%s2060_s3 + $0xf8] sm:$0xf0]  ;;  %v1354_v18 = vld [vmem:[%s2060_s3 + $0x64] sm:$0xf0]  ;;  %301 = vmatpush.bf16.msra.mxu2 %v1016_v8 }
   0x5   :  { %314 = vmatpush.bf16.msra.mxu3 %v1080_v9  ;;  %v1084_v19 = vor.u32 %v1371_v12, %v1081_v16  ;;  %v1008_v20 = vor.u32 %v1354_v18, %v1007_v17  ;;  %v1071_v21 = vld [vmem:[%s2060_s3 + $0xe0] sm:$0xf]  ;;  %v1370_v22 = vld [vmem:[%s2060_s3 + $0xe4] sm:$0xf0]  ;;  %v1353_v23 = vld [vmem:[%s2060_s3 + $0x64] sm:$0xf] }
   0x6   :  { %v68_v24 = vsel %vm66_vm0, %v60_v13, 0  ;;  %v71_v25 = vsel %vm66_vm0, %v61_v14, 0  ;;  %v1072_v27 = vor.u32 %v1370_v22, %v1071_v21  ;;  %v1009_v28 = vld [vmem:[%s2060_s3 + $0x68] sm:$0xf0]  ;;  %v1369_v29 = vld [vmem:[%s2060_s3 + $0xe4] sm:$0xf] }
   0x7   :  { %80 = vmatpush.bf16.msra.mxu0 %v68_v24  ;;  %93 = vmatpush.bf16.msra.mxu1 %v71_v25  ;;  %v1073_v30 = vld [vmem:[%s2060_s3 + $0xe8] sm:$0xf0]  ;;  %v999_v31 = vld [vmem:[%s2060_s3 + $0x50] sm:$0xf]  ;;  %v1352_v32 = vld [vmem:[%s2060_s3 + $0x54] sm:$0xf0]  ;;  %v1012_v33 = vor.u32 %v1353_v23, %v1009_v28 }
   0x8   :  { %v1076_v34 = vor.u32 %v1369_v29, %v1073_v30  ;;  %v1063_v35 = vld [vmem:[%s2060_s3 + $0xd0] sm:$0xf]  ;;  %v1368_v36 = vld [vmem:[%s2060_s3 + $0xd4] sm:$0xf0]  ;;  %v1351_v37 = vld [vmem:[%s2060_s3 + $0x54] sm:$0xf]  ;;  %302 = vmatpush.bf16.msra.mxu2 %v1008_v20  ;;  %v1000_v38 = vor.u32 %v1352_v32, %v999_v31 }
   0x9   :  { %315 = vmatpush.bf16.msra.mxu3 %v1072_v27  ;;  %v1064_v39 = vor.u32 %v1368_v36, %v1063_v35  ;;  %v1001_v40 = vld [vmem:[%s2060_s3 + $0x58] sm:$0xf0]  ;;  %v1367_v41 = vld [vmem:[%s2060_s3 + $0xd4] sm:$0xf]  ;;  %v991_v43 = vld [vmem:[%s2060_s3 + $0x40] sm:$0xf] }
   0xa   :  { %v1065_v42 = vld [vmem:[%s2060_s3 + $0xd8] sm:$0xf0]  ;;  %955 = vmatmul.msk.bf16.vlgmr.msra.gmra.mxu0 %vm62_vm1, %v49_v26  ;;  %956 = vmatmul.msk.bf16.vlgmr.msra.gmra.mxu1 %vm62_vm1, %v49_v26  ;;  %v1350_v44 = vld [vmem:[%s2060_s3 + $0x44] sm:$0xf0]  ;;  %v1055_v45 = vld [vmem:[%s2060_s3 + $0xc0] sm:$0xf]  ;;  %v1004_v47 = vor.u32 %v1351_v37, %v1001_v40 }
   0xb   :  { %327 = vmatpush.bf16.msrb.mxu0 %v1020_v15  ;;  %340 = vmatpush.bf16.msrb.mxu1 %v1084_v19  ;;  %v1366_v46 = vld [vmem:[%s2060_s3 + $0xc4] sm:$0xf0]  ;;  %v1068_v48 = vor.u32 %v1367_v41, %v1065_v42  ;;  %v1349_v49 = vld [vmem:[%s2060_s3 + $0x44] sm:$0xf]  ;;  %v993_v50 = vld [vmem:[%s2060_s3 + $0x48] sm:$0xf0]  ;;  %v992_v51 = vor.u32 %v1350_v44, %v991_v43 }
   0xc   :  { %303 = vmatpush.bf16.msra.mxu2 %v1000_v38  ;;  %v1056_v52 = vor.u32 %v1366_v46, %v1055_v45  ;;  %v1365_v53 = vld [vmem:[%s2060_s3 + $0xc4] sm:$0xf]  ;;  %v1057_v54 = vld [vmem:[%s2060_s3 + $0xc8] sm:$0xf0]  ;;  %v983_v55 = vld [vmem:[%s2060_s3 + $0x30] sm:$0xf]  ;;  %v996_v60 = vor.u32 %v1349_v49, %v993_v50 }
   0xd   :  { %316 = vmatpush.bf16.msra.mxu3 %v1064_v39  ;;  %v1348_v56 = vld [vmem:[%s2060_s3 + $0x34] sm:$0xf0]  ;;  %v1047_v57 = vld [vmem:[%s2060_s3 + $0xb0] sm:$0xf]  ;;  %v1347_v59 = vld [vmem:[%s2060_s3 + $0x34] sm:$0xf]  ;;  %v1060_v61 = vor.u32 %v1365_v53, %v1057_v54 }
   0xe   :  { %v1364_v58 = vld [vmem:[%s2060_s3 + $0xb4] sm:$0xf0]  ;;  %v985_v62 = vld [vmem:[%s2060_s3 + $0x38] sm:$0xf0]  ;;  %v1363_v63 = vld [vmem:[%s2060_s3 + $0xb4] sm:$0xf]  ;;  %v984_v1 = vor.u32 %v1348_v56, %v983_v55 }
   0xf   :  { %328 = vmatpush.bf16.msrb.mxu0 %v1012_v33  ;;  %341 = vmatpush.bf16.msrb.mxu1 %v1076_v34  ;;  %v1049_v0 = vld [vmem:[%s2060_s3 + $0xb8] sm:$0xf0]  ;;  %v1048_v2 = vor.u32 %v1364_v58, %v1047_v57  ;;  %v975_v3 = vld [vmem:[%s2060_s3 + $0x20] sm:$0xf]  ;;  %v1346_v4 = vld [vmem:[%s2060_s3 + $0x24] sm:$0xf0] }
  0x10   :  { %304 = vmatpush.bf16.msra.mxu2 %v992_v51  ;;  %v1039_v5 = vld [vmem:[%s2060_s3 + $0xa0] sm:$0xf]  ;;  %v1362_v6 = vld [vmem:[%s2060_s3 + $0xa4] sm:$0xf0] }
  0x11   :  { %317 = vmatpush.bf16.msra.mxu3 %v1056_v52 }
  0x13   :  { %329 = vmatpush.bf16.msrb.mxu0 %v1004_v47  ;;  %342 = vmatpush.bf16.msrb.mxu1 %v1068_v48 }
  0x14   :  { %20 = vsyncpa [#allocation3], 0  ;;  %v988_v7 = vor.u32 %v1347_v59, %v985_v62  ;;  %v1052_v8 = vor.u32 %v1363_v63, %v1049_v0  ;;  %v1345_v9 = vld [vmem:[%s2060_s3 + $0x24] sm:$0xf]  ;;  %305 = vmatpush.bf16.msra.mxu2 %v984_v1  ;;  %v976_v10 = vor.u32 %v1346_v4, %v975_v3  ;;  %v1040_v11 = vor.u32 %v1362_v6, %v1039_v5  ;;  %v977_v12 = vld [vmem:[%s2060_s3 + $0x28] sm:$0xf0] }
  0x15   :  { %318 = vmatpush.bf16.msra.mxu3 %v1048_v2  ;;  %v1361_v13 = vld [vmem:[%s2060_s3 + $0xa4] sm:$0xf]  ;;  %v1041_v14 = vld [vmem:[%s2060_s3 + $0xa8] sm:$0xf0]  ;;  %v980_v15 = vor.u32 %v1345_v9, %v977_v12  ;;  %v967_v17 = vld [vmem:[%s2060_s3 + $0x10] sm:$0xf] }
  0x16   :  { %v1044_v16 = vor.u32 %v1361_v13, %v1041_v14  ;;  %v1344_v18 = vld [vmem:[%s2060_s3 + $0x14] sm:$0xf0]  ;;  %v1031_v19 = vld [vmem:[%s2060_s3 + $0x90] sm:$0xf]  ;;  %v1343_v22 = vld [vmem:[%s2060_s3 + $0x14] sm:$0xf] }
  0x17   :  { %330 = vmatpush.bf16.msrb.mxu0 %v996_v60  ;;  %343 = vmatpush.bf16.msrb.mxu1 %v1060_v61  ;;  %v968_v20 = vor.u32 %v1344_v18, %v967_v17  ;;  %v1360_v21 = vld [vmem:[%s2060_s3 + $0x94] sm:$0xf0]  ;;  %v969_v23 = vld [vmem:[%s2060_s3 + $0x18] sm:$0xf0]  ;;  %v1359_v26 = vld [vmem:[%s2060_s3 + $0x94] sm:$0xf] }
  0x18   :  { %306 = vmatpush.bf16.msra.mxu2 %v976_v10  ;;  %v1032_v24 = vor.u32 %v1360_v21, %v1031_v19  ;;  %v972_v25 = vor.u32 %v1343_v22, %v969_v23  ;;  %v1033_v27 = vld [vmem:[%s2060_s3 + $0x98] sm:$0xf0]  ;;  %v959_v29 = vld [vmem:[%s2060_s3] sm:$0xf]  ;;  %v1342_v30 = vld [vmem:[%s2060_s3 + $0x4] sm:$0xf0] }
  0x19   :  { %319 = vmatpush.bf16.msra.mxu3 %v1040_v11  ;;  %v1036_v28 = vor.u32 %v1359_v26, %v1033_v27  ;;  %v1023_v31 = vld [vmem:[%s2060_s3 + $0x80] sm:$0xf]  ;;  %v960_v32 = vor.u32 %v1342_v30, %v959_v29  ;;  %v1358_v33 = vld [vmem:[%s2060_s3 + $0x84] sm:$0xf0]  ;;  %v1341_v34 = vld [vmem:[%s2060_s3 + $0x4] sm:$0xf] }
  0x1a   :  { %v961_v35 = vld [vmem:[%s2060_s3 + $0x8] sm:$0xf0]  ;;  %v1024_v36 = vor.u32 %v1358_v33, %v1023_v31  ;;  %v1357_v38 = vld [vmem:[%s2060_s3 + $0x84] sm:$0xf]  ;;  %v1207_v41 = vld [vmem:[%s2062_s5 + $0xf0] sm:$0xf] }
  0x1b   :  { %331 = vmatpush.bf16.msrb.mxu0 %v988_v7  ;;  %344 = vmatpush.bf16.msrb.mxu1 %v1052_v8  ;;  %v964_v37 = vor.u32 %v1341_v34, %v961_v35  ;;  %v1025_v39 = vld [vmem:[%s2060_s3 + $0x88] sm:$0xf0]  ;;  %v1404_v42 = vld [vmem:[%s2062_s5 + $0xf4] sm:$0xf0]  ;;  %v1403_v43 = vld [vmem:[%s2062_s5 + $0xf4] sm:$0xf] }
  0x1c   :  { %307 = vmatpush.bf16.msra.mxu2 %v968_v20  ;;  %v1028_v40 = vor.u32 %v1357_v38, %v1025_v39  ;;  %v1208_v44 = vor.u32 %v1404_v42, %v1207_v41  ;;  %v1209_v45 = vld [vmem:[%s2062_s5 + $0xf8] sm:$0xf0]  ;;  %v1199_v46 = vld [vmem:[%s2062_s5 + $0xe0] sm:$0xf]  ;;  %v1402_v47 = vld [vmem:[%s2062_s5 + $0xe4] sm:$0xf0] }
  0x1d   :  { %320 = vmatpush.bf16.msra.mxu3 %v1032_v24  ;;  %v1212_v48 = vor.u32 %v1403_v43, %v1209_v45  ;;  %v1401_v49 = vld [vmem:[%s2062_s5 + $0xe4] sm:$0xf]  ;;  %v1201_v50 = vld [vmem:[%s2062_s5 + $0xe8] sm:$0xf0]  ;;  %v1143_v51 = vld [vmem:[%s2062_s5 + $0x70] sm:$0xf]  ;;  %v1200_v52 = vor.u32 %v1402_v47, %v1199_v46 }
  0x1e   :  { %v1388_v53 = vld [vmem:[%s2062_s5 + $0x74] sm:$0xf0]  ;;  %v1387_v54 = vld [vmem:[%s2062_s5 + $0x74] sm:$0xf]  ;;  %v1145_v55 = vld [vmem:[%s2062_s5 + $0x78] sm:$0xf0]  ;;  %v1204_v56 = vor.u32 %v1401_v49, %v1201_v50 }
  0x1f   :  { %332 = vmatpush.bf16.msrb.mxu0 %v980_v15  ;;  %345 = vmatpush.bf16.msrb.mxu1 %v1044_v16  ;;  %v1144_v57 = vor.u32 %v1388_v53, %v1143_v51  ;;  %v1148_v58 = vor.u32 %v1387_v54, %v1145_v55  ;;  %v1191_v59 = vld [vmem:[%s2062_s5 + $0xd0] sm:$0xf]  ;;  %v1400_v60 = vld [vmem:[%s2062_s5 + $0xd4] sm:$0xf0]  ;;  %v1399_v61 = vld [vmem:[%s2062_s5 + $0xd4] sm:$0xf] }
  0x20   :  { %308 = vmatpush.bf16.msra.mxu2 %v960_v32  ;;  %v1193_v62 = vld [vmem:[%s2062_s5 + $0xd8] sm:$0xf0]  ;;  %v1135_v63 = vld [vmem:[%s2062_s5 + $0x60] sm:$0xf]  ;;  %v1386_v0 = vld [vmem:[%s2062_s5 + $0x64] sm:$0xf0]  ;;  %v1192_v4 = vor.u32 %v1400_v60, %v1191_v59 }
  0x21   :  { %321 = vmatpush.bf16.msra.mxu3 %v1024_v36  ;;  %v1136_v1 = vor.u32 %v1386_v0, %v1135_v63  ;;  %v1385_v2 = vld [vmem:[%s2062_s5 + $0x64] sm:$0xf]  ;;  %v1137_v3 = vld [vmem:[%s2062_s5 + $0x68] sm:$0xf0]  ;;  %v1183_v6 = vld [vmem:[%s2062_s5 + $0xc0] sm:$0xf]  ;;  %v1196_v8 = vor.u32 %v1399_v61, %v1193_v62 }
  0x22   :  { %v1140_v5 = vor.u32 %v1385_v2, %v1137_v3  ;;  %v1398_v7 = vld [vmem:[%s2062_s5 + $0xc4] sm:$0xf0]  ;;  %v1127_v9 = vld [vmem:[%s2062_s5 + $0x50] sm:$0xf]  ;;  %v1384_v10 = vld [vmem:[%s2062_s5 + $0x54] sm:$0xf0] }
  0x23   :  { %333 = vmatpush.bf16.msrb.mxu0 %v972_v25  ;;  %346 = vmatpush.bf16.msrb.mxu1 %v1036_v28  ;;  %v1383_v11 = vld [vmem:[%s2062_s5 + $0x54] sm:$0xf]  ;;  %v1397_v12 = vld [vmem:[%s2062_s5 + $0xc4] sm:$0xf]  ;;  %v1185_v13 = vld [vmem:[%s2062_s5 + $0xc8] sm:$0xf0]  ;;  %v1128_v15 = vor.u32 %v1384_v10, %v1127_v9  ;;  %v1184_v18 = vor.u32 %v1398_v7, %v1183_v6 }
  0x24   :  { %555 = vmatpush.bf16.msrb.mxu2 %v1144_v57  ;;  %v1129_v14 = vld [vmem:[%s2062_s5 + $0x58] sm:$0xf0]  ;;  %v1119_v17 = vld [vmem:[%s2062_s5 + $0x40] sm:$0xf]  ;;  %v1382_v19 = vld [vmem:[%s2062_s5 + $0x44] sm:$0xf0]  ;;  %v1188_v22 = vor.u32 %v1397_v12, %v1185_v13 }
  0x25   :  { %568 = vmatpush.bf16.msrb.mxu3 %v1208_v44  ;;  %v1132_v16 = vor.u32 %v1383_v11, %v1129_v14  ;;  %v1381_v20 = vld [vmem:[%s2062_s5 + $0x44] sm:$0xf]  ;;  %v1121_v21 = vld [vmem:[%s2062_s5 + $0x48] sm:$0xf0]  ;;  %v1175_v23 = vld [vmem:[%s2062_s5 + $0xb0] sm:$0xf]  ;;  %v1120_v27 = vor.u32 %v1382_v19, %v1119_v17 }
  0x26   :  { %v1396_v24 = vld [vmem:[%s2062_s5 + $0xb4] sm:$0xf0]  ;;  %v1395_v25 = vld [vmem:[%s2062_s5 + $0xb4] sm:$0xf]  ;;  %v1177_v26 = vld [vmem:[%s2062_s5 + $0xb8] sm:$0xf0]  ;;  %v1124_v28 = vor.u32 %v1381_v20, %v1121_v21 }
  0x27   :  { %334 = vmatpush.bf16.msrb.mxu0 %v964_v37  ;;  %347 = vmatpush.bf16.msrb.mxu1 %v1028_v40  ;;  %v1176_v29 = vor.u32 %v1396_v24, %v1175_v23  ;;  %v1180_v30 = vor.u32 %v1395_v25, %v1177_v26  ;;  %v1167_v31 = vld [vmem:[%s2062_s5 + $0xa0] sm:$0xf]  ;;  %v1394_v32 = vld [vmem:[%s2062_s5 + $0xa4] sm:$0xf0]  ;;  %v1393_v33 = vld [vmem:[%s2062_s5 + $0xa4] sm:$0xf] }
  0x28   :  { %556 = vmatpush.bf16.msrb.mxu2 %v1136_v1  ;;  %v1169_v34 = vld [vmem:[%s2062_s5 + $0xa8] sm:$0xf0]  ;;  %v51_v35 = vld [vmem:[%s2059_s2] sm:$0x3]  ;;  %v1168_v36 = vor.u32 %v1394_v32, %v1167_v31  ;;  %v1111_v50 = vld [vmem:[%s2062_s5 + $0x30] sm:$0xf] }
  0x29   :  { %569 = vmatpush.bf16.msrb.mxu3 %v1200_v52  ;;  %v1172_v37 = vor.u32 %v1393_v33, %v1169_v34  ;;  %v53_v38 = vperm.slane %v51_v35, 0  ;;  %v54_v39 = vperm.slane %v51_v35, 1  ;;  %v1380_v51 = vld [vmem:[%s2062_s5 + $0x34] sm:$0xf0]  ;;  %v1379_v52 = vld [vmem:[%s2062_s5 + $0x34] sm:$0xf] }
  0x2a   :  { %v1112_v53 = vor.u32 %v1380_v51, %v1111_v50  ;;  %v1113_v54 = vld [vmem:[%s2062_s5 + $0x38] sm:$0xf0]  ;;  %v1392_v57 = vld [vmem:[%s2062_s5 + $0x94] sm:$0xf0]  ;;  %v1103_v62 = vld [vmem:[%s2062_s5 + $0x20] sm:$0xf] }
  0x2b   :  { %594 = vmatpush.bf16.msra.mxu1 %v1212_v48  ;;  %581 = vmatpush.bf16.msra.mxu0 %v1148_v58  ;;  %v1116_v55 = vor.u32 %v1379_v52, %v1113_v54  ;;  %v1391_v58 = vld [vmem:[%s2062_s5 + $0x94] sm:$0xf]  ;;  %v1161_v60 = vld [vmem:[%s2062_s5 + $0x98] sm:$0xf0]  ;;  %v1378_v63 = vld [vmem:[%s2062_s5 + $0x24] sm:$0xf0] }
  0x2c   :  { %557 = vmatpush.bf16.msrb.mxu2 %v1128_v15  ;;  %v1164_v61 = vor.u32 %v1391_v58, %v1161_v60  ;;  %v1377_v0 = vld [vmem:[%s2062_s5 + $0x24] sm:$0xf]  ;;  %v1104_v1 = vor.u32 %v1378_v63, %v1103_v62  ;;  %v1105_v2 = vld [vmem:[%s2062_s5 + $0x28] sm:$0xf0]  ;;  %v1095_v10 = vld [vmem:[%s2062_s5 + $0x10] sm:$0xf] }
  0x2d   :  { %570 = vmatpush.bf16.msrb.mxu3 %v1192_v4  ;;  %v1108_v3 = vor.u32 %v1377_v0, %v1105_v2  ;;  %v1151_v4 = vld [vmem:[%s2062_s5 + $0x80] sm:$0xf]  ;;  %v1389_v6 = vld [vmem:[%s2062_s5 + $0x84] sm:$0xf]  ;;  %v1376_v11 = vld [vmem:[%s2062_s5 + $0x14] sm:$0xf0] }
  0x2e   :  { %v1096_v12 = vor.u32 %v1376_v11, %v1095_v10  ;;  %v1375_v13 = vld [vmem:[%s2062_s5 + $0x14] sm:$0xf]  ;;  %v1097_v14 = vld [vmem:[%s2062_s5 + $0x18] sm:$0xf0]  ;;  %v1374_v17 = vld [vmem:[%s2062_s5 + $0x4] sm:$0xf0] }
  0x2f   :  { %595 = vmatpush.bf16.msra.mxu1 %v1204_v56  ;;  %582 = vmatpush.bf16.msra.mxu0 %v1140_v5  ;;  %v1159_v56 = vld [vmem:[%s2062_s5 + $0x90] sm:$0xf]  ;;  %v1390_v5 = vld [vmem:[%s2062_s5 + $0x84] sm:$0xf0]  ;;  %v1100_v15 = vor.u32 %v1375_v13, %v1097_v14  ;;  %v1089_v20 = vld [vmem:[%s2062_s5 + $0x8] sm:$0xf0] }
  0x30   :  { %558 = vmatpush.bf16.msrb.mxu2 %v1120_v27  ;;  %v1160_v59 = vor.u32 %v1392_v57, %v1159_v56  ;;  %v1152_v7 = vor.u32 %v1390_v5, %v1151_v4  ;;  %v1412_v23 = vld [vmem:[%s2064_s7 + $0x38] sm:$0xff]  ;;  %v1419_v24 = vld [vmem:[%s2064_s7 + $0x70] sm:$0xff]  ;;  %v1418_v26 = vld [vmem:[%s2064_s7 + $0x68] sm:$0xff]  ;;  %s1467_s29 = smov [#allocation2]   ;;  %s942_s17 = sshll.u32 %s2070_s13, 4  ;;  %s943_s17 = int_to_ptr.hbm [resolvable:$true] %s942_s17 }
  0x31   :  { %571 = vmatpush.bf16.msrb.mxu3 %v1184_v18  ;;  %v1373_v18 = vld [vmem:[%s2062_s5 + $0x4] sm:$0xf]  ;;  %v1411_v25 = vld [vmem:[%s2064_s7 + $0x30] sm:$0xff]  ;;  %v1410_v27 = vld [vmem:[%s2064_s7 + $0x28] sm:$0xff]  ;;  %s940_s30 = sshll.u32 %s1467_s29, 4  ;;  %s941_s30 = int_to_ptr.vmem [resolvable:$true] %s940_s30 }
  0x32   :  { %v1092_v21 = vor.u32 %v1373_v18, %v1089_v20  ;;  %v1415_v50 = vld [vmem:[%s2064_s7 + $0x50] sm:$0xff]  ;;  %v1408_v51 = vld [vmem:[%s2064_s7 + $0x18] sm:$0xff]  ;;  %v1414_v52 = vld [vmem:[%s2064_s7 + $0x48] sm:$0xff] }
  0x33   :  { %596 = vmatpush.bf16.msra.mxu1 %v1196_v8  ;;  %583 = vmatpush.bf16.msra.mxu0 %v1132_v16  ;;  %v1153_v8 = vld [vmem:[%s2062_s5 + $0x88] sm:$0xf0]  ;;  %v1087_v16 = vld [vmem:[%s2062_s5] sm:$0xf]  ;;  %v1428_v57 = vld [vmem:[%s2066_s9 + $0x38] sm:$0xff] }
  0x34   :  { %559 = vmatpush.bf16.msrb.mxu2 %v1112_v53  ;;  %v1156_v9 = vor.u32 %v1389_v6, %v1153_v8  ;;  %v1088_v19 = vor.u32 %v1374_v17, %v1087_v16  ;;  %v1407_v53 = vld [vmem:[%s2064_s7 + $0x10] sm:$0xff]  ;;  %v1413_v54 = vld [vmem:[%s2064_s7 + $0x40] sm:$0xff]  ;;  %v1424_v14 = vld [vmem:[%s2066_s9 + $0x18] sm:$0xff] }
  0x35   :  { %572 = vmatpush.bf16.msrb.mxu3 %v1176_v29  ;;  %v135_v29 = vld [vmem:[%s2061_s4] sm:$0x3]  ;;  %v1427_v58 = vld [vmem:[%s2066_s9 + $0x30] sm:$0xff]  ;;  %v1422_v16 = vld [vmem:[%s2066_s9 + $0x8] sm:$0xff] }
  0x36   :  { %v138_v31 = vperm.slane %v135_v29, 1  ;;  %v137_v35 = vperm.slane %v135_v29, 0  ;;  %v1405_v56 = vld [vmem:[%s2064_s7] sm:$0xff]  ;;  %v1436_v18 = vld [vmem:[%s2068_s11 + $0x38] sm:$0xff]  ;;  %v1434_v20 = vld [vmem:[%s2068_s11 + $0x28] sm:$0xff] }
  0x37   :  { %597 = vmatpush.bf16.msra.mxu1 %v1188_v22  ;;  %584 = vmatpush.bf16.msra.mxu0 %v1124_v28  ;;  %v1420_v22 = vld [vmem:[%s2064_s7 + $0x78] sm:$0xff]  ;;  %v1417_v28 = vld [vmem:[%s2064_s7 + $0x60] sm:$0xff] }
  0x38   :  { %560 = vmatpush.bf16.msrb.mxu2 %v1104_v1  ;;  %v1425_v60 = vld [vmem:[%s2066_s9 + $0x20] sm:$0xff] }
  0x39   :  { %573 = vmatpush.bf16.msrb.mxu3 %v1168_v36  ;;  %v1421_v17 = vld [vmem:[%s2066_s9] sm:$0xff] }
  0x3b   :  { %598 = vmatpush.bf16.msra.mxu1 %v1180_v30  ;;  %585 = vmatpush.bf16.msra.mxu0 %v1116_v55  ;;  %v1416_v30 = vld [vmem:[%s2064_s7 + $0x58] sm:$0xff]  ;;  %v1406_v55 = vld [vmem:[%s2064_s7 + $0x8] sm:$0xff] }
  0x3c   :  { %561 = vmatpush.bf16.msrb.mxu2 %v1096_v12 }
  0x3d   :  { %574 = vmatpush.bf16.msrb.mxu3 %v1160_v59  ;;  %v1426_v59 = vld [vmem:[%s2066_s9 + $0x28] sm:$0xff] }
  0x3f   :  { %599 = vmatpush.bf16.msra.mxu1 %v1172_v37  ;;  %586 = vmatpush.bf16.msra.mxu0 %v1108_v3 }
  0x40   :  { %562 = vmatpush.bf16.msrb.mxu2 %v1088_v19  ;;  %v1435_v19 = vld [vmem:[%s2068_s11 + $0x30] sm:$0xff] }
  0x41   :  { %575 = vmatpush.bf16.msrb.mxu3 %v1152_v7 }
  0x43   :  { %600 = vmatpush.bf16.msra.mxu1 %v1164_v61  ;;  %587 = vmatpush.bf16.msra.mxu0 %v1100_v15  ;;  %v389_v61 = vld [vmem:[%s2063_s6] sm:$0x3]  ;;  %v1423_v15 = vld [vmem:[%s2066_s9 + $0x10] sm:$0xff] }
  0x44   :  { %v392_v63 = vperm.slane %v389_v61, 1  ;;  %v391_v5 = vperm.slane %v389_v61, 0 }
  0x47   :  { %601 = vmatpush.bf16.msra.mxu1 %v1156_v9  ;;  %588 = vmatpush.bf16.msra.mxu0 %v1092_v21  ;;  %v1433_v21 = vld [vmem:[%s2068_s11 + $0x20] sm:$0xff] }
  0x87   :  { %v82_v40 = vpop.f32.mrf.mxu0  ;;  %v95_v41 = vpop.f32.mrf.mxu1 }
  0x88   :  { %v83_v42 = vadd.f32 %v82_v40, %v53_v38  ;;  %v96_v43 = vadd.f32 %v95_v41, %v54_v39 }
  0x8a   :  { %v99_v44 = vmax.f32 %v83_v42, 0.0  ;;  %v100_v45 = vmax.f32 %v96_v43, 0.0 }
  0x8c   :  { %v101_v46 = vpack.c.bf16 %v99_v44, %v99_v44  ;;  %v102_v47 = vpack.c.bf16 %v100_v45, %v100_v45 }
  0x8e   :  { %309 = vmatmul.bf16.vlgmr.msra.gmra.mxu2 %v101_v46  ;;  %322 = vmatmul.bf16.vlgmr.msra.gmra.mxu3 %v102_v47 }
  0x8f   :  { %335 = vmatmul.bf16.vlgmr.msrb.gmra.mxu0 %v101_v46  ;;  %348 = vmatmul.bf16.vlgmr.msrb.gmra.mxu1 %v102_v47  ;;  %v84_v48 = vpop.f32.mrf.mxu0  ;;  %v97_v49 = vpop.f32.mrf.mxu1 }
  0x90   :  { %755 = vmatpush.bf16.msra.mxu3 %v1420_v22  ;;  %742 = vmatpush.bf16.msra.mxu2 %v1412_v23  ;;  %v1409_v49 = vld [vmem:[%s2064_s7 + $0x20] sm:$0xff]  ;;  %v1432_v22 = vld [vmem:[%s2068_s11 + $0x18] sm:$0xff] }
  0x91   :  { %838 = vmatpush.bf16.msrb.mxu0 %v1428_v57  ;;  %921 = vmatpush.bf16.msrb.mxu1 %v1436_v18 }
  0x94   :  { %756 = vmatpush.bf16.msra.mxu3 %v1419_v24  ;;  %743 = vmatpush.bf16.msra.mxu2 %v1411_v25  ;;  %v1431_v24 = vld [vmem:[%s2068_s11 + $0x10] sm:$0xff]  ;;  %v1438_v25 = vld [vmem:[%s2065_s8] ss:$0 sm:$0xff] }
  0x95   :  { %839 = vmatpush.bf16.msrb.mxu0 %v1427_v58  ;;  %922 = vmatpush.bf16.msrb.mxu1 %v1435_v19 }
  0x98   :  { %757 = vmatpush.bf16.msra.mxu3 %v1418_v26  ;;  %744 = vmatpush.bf16.msra.mxu2 %v1410_v27 }
  0x99   :  { %840 = vmatpush.bf16.msrb.mxu0 %v1426_v59  ;;  %923 = vmatpush.bf16.msrb.mxu1 %v1434_v20 }
  0x9c   :  { %758 = vmatpush.bf16.msra.mxu3 %v1417_v28  ;;  %745 = vmatpush.bf16.msra.mxu2 %v1409_v49 }
  0x9d   :  { %841 = vmatpush.bf16.msrb.mxu0 %v1425_v60  ;;  %924 = vmatpush.bf16.msrb.mxu1 %v1433_v21 }
  0xa0   :  { %759 = vmatpush.bf16.msra.mxu3 %v1416_v30  ;;  %746 = vmatpush.bf16.msra.mxu2 %v1408_v51 }
  0xa1   :  { %842 = vmatpush.bf16.msrb.mxu0 %v1424_v14  ;;  %925 = vmatpush.bf16.msrb.mxu1 %v1432_v22 }
  0xa4   :  { %760 = vmatpush.bf16.msra.mxu3 %v1415_v50  ;;  %747 = vmatpush.bf16.msra.mxu2 %v1407_v53 }
  0xa5   :  { %843 = vmatpush.bf16.msrb.mxu0 %v1423_v15  ;;  %926 = vmatpush.bf16.msrb.mxu1 %v1431_v24 }
  0xa8   :  { %761 = vmatpush.bf16.msra.mxu3 %v1414_v52  ;;  %748 = vmatpush.bf16.msra.mxu2 %v1406_v55 }
  0xa9   :  { %844 = vmatpush.bf16.msrb.mxu0 %v1422_v16 }
  0xac   :  { %762 = vmatpush.bf16.msra.mxu3 %v1413_v54  ;;  %749 = vmatpush.bf16.msra.mxu2 %v1405_v56 }
  0xad   :  { %845 = vmatpush.bf16.msrb.mxu0 %v1421_v17 }
 0x10c   :  { %v336_v32 = vpop.f32.mrf.mxu0  ;;  %v349_v33 = vpop.f32.mrf.mxu1 }
 0x10d   :  { %v337_v34 = vadd.f32 %v336_v32, %v138_v31 }
 0x10f   :  { %v350_v36 = vadd.f32 %v349_v33, %v337_v34  ;;  %v1430_v33 = vld [vmem:[%s2068_s11 + $0x8] sm:$0xff]  ;;  %v1429_v34 = vld [vmem:[%s2068_s11] sm:$0xff] }
 0x110   :  { %927 = vmatpush.bf16.msrb.mxu1 %v1430_v33 }
 0x111   :  { %v354_v37 = vmax.f32 %v350_v36, 0.0  ;;  %v310_v38 = vpop.f32.mrf.mxu2  ;;  %v323_v39 = vpop.f32.mrf.mxu3 }
 0x112   :  { %v311_v40 = vadd.f32 %v310_v38, %v137_v35  ;;  %v1439_v35 = vld [vmem:[%s2067_s10] ss:$0 sm:$0xff] }
 0x113   :  { %v356_v41 = vpack.c.bf16 %v354_v37, %v354_v37 }
 0x114   :  { %v324_v42 = vadd.f32 %v323_v39, %v311_v40  ;;  %v338_v43 = vpop.f32.mrf.mxu0  ;;  %v351_v44 = vpop.f32.mrf.mxu1  ;;  %928 = vmatpush.bf16.msrb.mxu1 %v1429_v34 }
 0x115   :  { %576 = vmatmul.bf16.vlgmr.msrb.gmra.mxu3 %v356_v41  ;;  %602 = vmatmul.bf16.vlgmr.msra.gmra.mxu1 %v356_v41  ;;  %v1440_v41 = vld [vmem:[%s2069_s12] ss:$0 sm:$0xff] }
 0x116   :  { %v353_v45 = vmax.f32 %v324_v42, 0.0 }
 0x118   :  { %v355_v46 = vpack.c.bf16 %v353_v45, %v353_v45 }
 0x119   :  { %v312_v47 = vpop.f32.mrf.mxu2  ;;  %v325_v48 = vpop.f32.mrf.mxu3 }
 0x11a   :  { %563 = vmatmul.bf16.vlgmr.msrb.gmra.mxu2 %v355_v46  ;;  %589 = vmatmul.bf16.vlgmr.msra.gmra.mxu0 %v355_v46 }
 0x192   :  { %v603_v62 = vpop.f32.mrf.mxu1 }
 0x197   :  { %v590_v0 = vpop.f32.mrf.mxu0 }
 0x198   :  { %v577_v1 = vpop.f32.mrf.mxu3  ;;  %v591_v2 = vadd.f32 %v590_v0, %v392_v63 }
 0x19a   :  { %v604_v3 = vadd.f32 %v603_v62, %v591_v2  ;;  %v605_v4 = vpop.f32.mrf.mxu1 }
 0x19c   :  { %v609_v6 = vpack.c.bf16 %v604_v3, %v604_v3 }
 0x19d   :  { %v564_v7 = vpop.f32.mrf.mxu2 }
 0x19e   :  { %v565_v8 = vadd.f32 %v564_v7, %v391_v5  ;;  %763 = vmatmul.bf16.vlgmr.msra.gmra.mxu3 %v609_v6 }
 0x19f   :  { %v592_v9 = vpop.f32.mrf.mxu0 }
 0x1a0   :  { %v578_v10 = vadd.f32 %v577_v1, %v565_v8  ;;  %v579_v11 = vpop.f32.mrf.mxu3 }
 0x1a2   :  { %v608_v12 = vpack.c.bf16 %v578_v10, %v578_v10  ;;  %607 = vst [vmem:[#allocation2] sm:$0xff] %v578_v10 }
 0x1a3   :  { %945 = dma.vmem_to_hbm [thread:$0]  %s941_s30, 128, %s943_s17, [#allocation3]  }
 0x1a4   :  { %750 = vmatmul.bf16.vlgmr.msra.gmra.mxu2 %v608_v12 }
 0x1a5   :  { %v566_v13 = vpop.f32.mrf.mxu2 }
 0x221   :  { %v764_v23 = vpop.f32.mrf.mxu3 }
 0x227   :  { %v751_v26 = vpop.f32.mrf.mxu2 }
 0x228   :  { %v752_v27 = vadd.f32 %v1438_v25, %v751_v26 }
 0x229   :  { %v766_v28 = vpop.f32.mrf.mxu3 }
 0x22a   :  { %v765_v29 = vadd.f32 %v764_v23, %v752_v27 }
 0x22c   :  { %v768_v30 = vmax.f32 %v765_v29, 0.0 }
 0x22e   :  { %v769_v31 = vpack.c.bf16 %v768_v30, %v768_v30 }
 0x22f   :  { %v753_v32 = vpop.f32.mrf.mxu2 }
 0x230   :  { %846 = vmatmul.bf16.vlgmr.msrb.gmra.mxu0 %v769_v31 }
 0x2ad   :  { %v847_v36 = vpop.f32.mrf.mxu0 }
 0x2ae   :  { %v848_v37 = vadd.f32 %v1439_v35, %v847_v36 }
 0x2b0   :  { %v851_v38 = vmax.f32 %v848_v37, 0.0 }
 0x2b2   :  { %v852_v39 = vpack.c.bf16 %v851_v38, %v851_v38 }
 0x2b4   :  { %929 = vmatmul.bf16.vlgmr.msrb.gmra.mxu1 %v852_v39 }
 0x2b5   :  { %v849_v40 = vpop.f32.mrf.mxu0 }
 0x331   :  { %v930_v42 = vpop.f32.mrf.mxu1 }
 0x332   :  { %v931_v43 = vadd.f32 %v1440_v41, %v930_v42 }
 0x334   :  { %934 = vst [vmem:[%s2071_s14] sm:$0xff] %v931_v43 }
 0x339   :  { %v932_v44 = vpop.f32.mrf.mxu1 }
 0x33a   :  { %1465 = dma.done.wait [#allocation3], 128  }
 0x33b   :  { %1466 = vsyncadd [#allocation3], 4294967168 }
 0x33c   :  { %954 = vsyncpa [#allocation3], 1 }

</bundles_post_ra>
